<compile_context>
chip_gen: v6e
topology: v6e:2x2x1
jax: 0.10.0
libtpu: 0.0.40
codegen_flags: <defaults>
</compile_context>

<pallas_src>
import jax
import jax.numpy as jnp
from jax import lax
from jax.experimental import pallas as pl
from jax.experimental.pallas import tpu as pltpu


# --------------------------------------------------------------------------- #
# Kernel
# --------------------------------------------------------------------------- #
def critic_kernel(s_ref, a_ref, w1s_ref, w1a_ref, b1_ref, w2_ref, b2_ref,
                  w3_ref, b3_ref, o_ref):
    cd = w1s_ref.dtype                      # compute dtype (bf16 or f32)

    # ---- Layer 1: split matmul replaces cat([s, a]) @ W1 (no HBM concat). ----
    # Inputs arrive as f32 and are cast here (VPU has huge slack; this halves
    # the activation HBM traffic vs. a wrapper-side cast pass).
    s = s_ref[...].astype(cd)
    a = a_ref[...].astype(cd)
    h1 = jnp.dot(s, w1s_ref[...], preferred_element_type=jnp.float32)
    h1 = h1 + jnp.dot(a, w1a_ref[...], preferred_element_type=jnp.float32)
    h1 = jnp.maximum(h1 + b1_ref[...], 0.0)           # bias/ReLU in f32 (VPU)

    # ---- Layer 2: Linear + ReLU ----
    h2 = jnp.dot(h1.astype(w2_ref.dtype), w2_ref[...],
                 preferred_element_type=jnp.float32)
    h2 = jnp.maximum(h2 + b2_ref[...], 0.0)

    # ---- Layer 3: lane-dense output row (1, TILE_B) instead of (TILE_B, 1). ----
    # q_row[0, b] = sum_f w3[0, f] * h2[b, f]
    q = lax.dot_general(
        w3_ref[...], h2.astype(w3_ref.dtype),
        dimension_numbers=(((1,), (1,)), ((), ())),
        preferred_element_type=jnp.float32,
    )                                                  # (1, TILE_B)
    o_ref[...] = (q + b3_ref[...]).astype(o_ref.dtype)


# --------------------------------------------------------------------------- #
# Parameter prep (one-time; hoisted out of the per-call forward)
# --------------------------------------------------------------------------- #
def prepare_critic_params(params, state_dim, *, compute_dtype=jnp.bfloat16):
    """Split/cast/reshape the raw (in,out)-layout params once, outside forward."""
    w1, b1, w2, b2, w3, b3 = params
    cd = compute_dtype
    fc2_dims = w2.shape[1]
    return {
        "w1s": w1[:state_dim].astype(cd),              # (state_dim, fc1)
        "w1a": w1[state_dim:].astype(cd),              # (action_dim, fc1)
        "b1":  b1.reshape(1, -1).astype(jnp.float32),  # (1, fc1)
        "w2":  w2.astype(cd),                          # (fc1, fc2)
        "b2":  b2.reshape(1, -1).astype(jnp.float32),  # (1, fc2)
        "w3":  w3.reshape(1, fc2_dims).astype(cd),     # (1, fc2)
        "b3":  b3.reshape(1, 1).astype(jnp.float32),   # (1, 1)
    }


# --------------------------------------------------------------------------- #
# Tiling policy
# --------------------------------------------------------------------------- #
def _round_up(x, m):
    return ((x + m - 1) // m) * m


def _select_batch_tiling(batch, tile_b):
    """Return (tile_rows, n_tiles, input_rows).

    input_rows == batch means no wrapper padding (ragged last block handled by
    Pallas); otherwise inputs are padded to the 8-row sublane multiple (tiny,
    single-tile small-batch case only).
    """
    b8 = _round_up(batch, 8)
    if b8 < 256:
        # Single small tile; pad to sublane multiple only (no pow2 blow-up).
        return b8, 1, b8
    # Multi-tile: at least 2 tiles (megacore on v7x, DMA/compute overlap),
    # tile rows a multiple of 128 so the lane-dense output block is legal.
    tile_b = max(128, (tile_b // 128) * 128)
    tb = min(tile_b, _round_up(pl.cdiv(batch, 2), 128))
    n_tiles = pl.cdiv(batch, tb)
    return tb, n_tiles, batch


# --------------------------------------------------------------------------- #
# Forward
# --------------------------------------------------------------------------- #
def critic_forward(s, a, prepared, *, tile_b=2048):
    """Pallas Critic forward. s: (B, state_dim), a: (B, action_dim) -> (B, 1) f32.

    `prepared` is the dict from prepare_critic_params (weights already split /
    cast / reshaped). Inputs stay float32; the kernel casts in VMEM.
    """
    B, state_dim = s.shape
    action_dim = a.shape[1]

    tb, n_tiles, in_rows = _select_batch_tiling(B, tile_b)
    s_in, a_in = s, a
    if in_rows != B:                       # tiny sublane pad (small-B only)
        s_in = jnp.pad(s, ((0, in_rows - B), (0, 0)))
        a_in = jnp.pad(a, ((0, in_rows - B), (0, 0)))
    out_cols = n_tiles * tb                # output padded to whole tiles (tiny)

    batch_map = lambda i: (i, 0)           # activations tiled over batch
    resident = lambda i: (0, 0)            # weights/biases resident across grid

    w1s, w1a = prepared["w1s"], prepared["w1a"]
    b1f, w2c, b2f = prepared["b1"], prepared["w2"], prepared["b2"]
    w3r, b3f = prepared["w3"], prepared["b3"]

    q_row = pl.pallas_call(
        critic_kernel,
        out_shape=jax.ShapeDtypeStruct((1, out_cols), jnp.float32),
        grid=(n_tiles,),
        in_specs=[
            pl.BlockSpec((tb, state_dim), batch_map),     # s tile (f32)
            pl.BlockSpec((tb, action_dim), batch_map),    # a tile (f32)
            pl.BlockSpec(w1s.shape, resident),
            pl.BlockSpec(w1a.shape, resident),
            pl.BlockSpec(b1f.shape, resident),
            pl.BlockSpec(w2c.shape, resident),
            pl.BlockSpec(b2f.shape, resident),
            pl.BlockSpec(w3r.shape, resident),
            pl.BlockSpec(b3f.shape, resident),
        ],
        out_specs=pl.BlockSpec((1, tb), lambda i: (0, i)),  # lane-dense output
        compiler_params=pltpu.CompilerParams(
            dimension_semantics=("parallel",),              # megacore on v7x
            # Default tile_b=2048 keeps the footprint well under every
            # generation's scoped-VMEM default; raise vmem_limit_bytes only if
            # you push tile_b toward 8192 on v5e.
        ),
    )(s_in, a_in, w1s, w1a, b1f, w2c, b2f, w3r, b3f)

    # Layout glue back to the PyTorch output shape (B, 1); drops padded/ragged
    # garbage columns (>= B), which never participate in any reduction.
    return q_row[0, :B].reshape(B, 1)


# --------------------------------------------------------------------------- #
# Init + pure-JAX reference
# --------------------------------------------------------------------------- #
def init_critic_params(key, state_dim, action_dim, fc1_dims, fc2_dims):
    """nn.Linear-style init (uniform +/- 1/sqrt(fan_in)); weights stored (in, out)."""
    ks = jax.random.split(key, 6)

    def lin(kw, kb, fan_in, fan_out):
        bound = 1.0 / jnp.sqrt(fan_in)
        w = jax.random.uniform(kw, (fan_in, fan_out), jnp.float32, -bound, bound)
        b = jax.random.uniform(kb, (1, fan_out), jnp.float32, -bound, bound)
        return w, b

    w1, b1 = lin(ks[0], ks[1], state_dim + action_dim, fc1_dims)
    w2, b2 = lin(ks[2], ks[3], fc1_dims, fc2_dims)
    w3, b3 = lin(ks[4], ks[5], fc2_dims, 1)
    return (w1, b1, w2, b2, w3, b3)


def critic_ref(s, a, params, compute_dtype=jnp.bfloat16):
    """Pure-JAX reference with matching dtype policy (cd inputs, f32 accumulate)."""
    w1, b1, w2, b2, w3, b3 = params
    cd = compute_dtype
    x = jnp.concatenate([s, a], axis=1).astype(cd)
    h1 = jnp.maximum(
        jnp.dot(x, w1.astype(cd), preferred_element_type=jnp.float32) + b1, 0.0)
    h2 = jnp.maximum(
        jnp.dot(h1.astype(cd), w2.astype(cd), preferred_element_type=jnp.float32) + b2, 0.0)
    q = jnp.dot(h2.astype(cd), w3.astype(cd),
                preferred_element_type=jnp.float32) + b3.reshape(1, 1)
    return q


# --------------------------------------------------------------------------- #
# Demo / self-test
# --------------------------------------------------------------------------- #
if __name__ == "__main__":
    state_dim = 24
    action_dim = 8
    fc1_dims = 64
    fc2_dims = 64

    key = jax.random.PRNGKey(0)
    k_params, k_s, k_a = jax.random.split(key, 3)

    raw_params = init_critic_params(k_params, state_dim, action_dim, fc1_dims, fc2_dims)
    prep_bf16 = prepare_critic_params(raw_params, state_dim)                       # bf16 MXU feed
    prep_f32 = prepare_critic_params(raw_params, state_dim, compute_dtype=jnp.float32)

    # batch=8: small single-tile path; 512: two exact tiles (megacore/pipelined);
    # 300: two tiles with a ragged last input block.
    for batch in (8, 512, 300):
        s = jax.random.normal(jax.random.fold_in(k_s, batch), (batch, state_dim), jnp.float32)
        a = jax.random.normal(jax.random.fold_in(k_a, batch), (batch, action_dim), jnp.float32)

        q = jax.block_until_ready(critic_forward(s, a, prep_bf16))
        assert q.shape == (batch, 1), q.shape
        q_ref = critic_ref(s, a, raw_params, jnp.bfloat16)
        assert jnp.allclose(q, q_ref, atol=2e-2, rtol=2e-2), f"bf16 mismatch at B={batch}"

        q32 = jax.block_until_ready(critic_forward(s, a, prep_f32))
        q32_ref = critic_ref(s, a, raw_params, jnp.float32)
        assert jnp.allclose(q32, q32_ref, atol=1e-4, rtol=1e-4), f"f32 mismatch at B={batch}"

    print("KERNEL_OK")
</pallas_src>

<mosaic_0001>
module attributes {stable_mosaic.version = 11 : i64} {
  func.func @critic_kernel(%arg0: i32, %arg1: memref<8x24xf32, #tpu.memory_space<vmem>>, %arg2: memref<8x8xf32, #tpu.memory_space<vmem>>, %arg3: memref<24x64xbf16, #tpu.memory_space<vmem>>, %arg4: memref<8x64xbf16, #tpu.memory_space<vmem>>, %arg5: memref<1x64xf32, #tpu.memory_space<vmem>>, %arg6: memref<64x64xbf16, #tpu.memory_space<vmem>>, %arg7: memref<1x64xf32, #tpu.memory_space<vmem>>, %arg8: memref<1x64xbf16, #tpu.memory_space<vmem>>, %arg9: memref<1x1xf32, #tpu.memory_space<vmem>>, %arg10: memref<1x8xf32, #tpu.memory_space<vmem>>) attributes {dimension_semantics = [#tpu.dimension_semantics<parallel>], iteration_bounds = array<i64: 1>, scalar_prefetch = 0 : i64, scratch_operands = 0 : i64, tpu.core_type = #tpu.core_type<tc>, window_params = [{transform_indices = @transform_0, window_bounds = array<i64: 8, 24>}, {transform_indices = @transform_1, window_bounds = array<i64: 8, 8>}, {pipeline_mode = #tpu.pipeline_mode<synchronous>, transform_indices = @transform_2, window_bounds = array<i64: 24, 64>}, {pipeline_mode = #tpu.pipeline_mode<synchronous>, transform_indices = @transform_3, window_bounds = array<i64: 8, 64>}, {pipeline_mode = #tpu.pipeline_mode<synchronous>, transform_indices = @transform_4, window_bounds = array<i64: 1, 64>}, {pipeline_mode = #tpu.pipeline_mode<synchronous>, transform_indices = @transform_5, window_bounds = array<i64: 64, 64>}, {pipeline_mode = #tpu.pipeline_mode<synchronous>, transform_indices = @transform_6, window_bounds = array<i64: 1, 64>}, {pipeline_mode = #tpu.pipeline_mode<synchronous>, transform_indices = @transform_7, window_bounds = array<i64: 1, 64>}, {pipeline_mode = #tpu.pipeline_mode<synchronous>, transform_indices = @transform_8, window_bounds = array<i64: 1, 1>}, {transform_indices = @transform_9, window_bounds = array<i64: 1, 8>}]} {
    %c0 = arith.constant 0 : index
    %c0_0 = arith.constant 0 : index
    %0 = vector.load %arg1[%c0, %c0_0] : memref<8x24xf32, #tpu.memory_space<vmem>>, vector<8x24xf32>
    %1 = arith.truncf %0 : vector<8x24xf32> to vector<8x24xbf16>
    %c0_1 = arith.constant 0 : index
    %c0_2 = arith.constant 0 : index
    %2 = vector.load %arg2[%c0_1, %c0_2] : memref<8x8xf32, #tpu.memory_space<vmem>>, vector<8x8xf32>
    %3 = arith.truncf %2 : vector<8x8xf32> to vector<8x8xbf16>
    %c0_3 = arith.constant 0 : index
    %c0_4 = arith.constant 0 : index
    %4 = vector.load %arg3[%c0_3, %c0_4] : memref<24x64xbf16, #tpu.memory_space<vmem>>, vector<24x64xbf16>
    %cst = arith.constant dense<0.000000e+00> : vector<8x64xf32>
    %5 = tpu.matmul %1, %4, %cst {dimension_numbers = #tpu.dot_dimension_numbers<[1], [0], [0], [1], [0, 0, 1, 1], [], []>} : vector<8x24xbf16>, vector<24x64xbf16>, vector<8x64xf32> -> vector<8x64xf32>
    %c0_5 = arith.constant 0 : index
    %c0_6 = arith.constant 0 : index
    %6 = vector.load %arg4[%c0_5, %c0_6] : memref<8x64xbf16, #tpu.memory_space<vmem>>, vector<8x64xbf16>
    %cst_7 = arith.constant dense<0.000000e+00> : vector<8x64xf32>
    %7 = tpu.matmul %3, %6, %cst_7 {dimension_numbers = #tpu.dot_dimension_numbers<[1], [0], [0], [1], [0, 0, 1, 1], [], []>} : vector<8x8xbf16>, vector<8x64xbf16>, vector<8x64xf32> -> vector<8x64xf32>
    %8 = arith.addf %5, %7 : vector<8x64xf32>
    %c0_8 = arith.constant 0 : index
    %c0_9 = arith.constant 0 : index
    %9 = vector.load %arg5[%c0_8, %c0_9] : memref<1x64xf32, #tpu.memory_space<vmem>>, vector<1x64xf32>
    %10 = vector.broadcast %9 : vector<1x64xf32> to vector<8x64xf32>
    %11 = arith.addf %8, %10 : vector<8x64xf32>
    %cst_10 = arith.constant 0.000000e+00 : f32
    %12 = vector.broadcast %cst_10 : f32 to vector<8x64xf32>
    %13 = arith.maximumf %11, %12 : vector<8x64xf32>
    %14 = arith.truncf %13 : vector<8x64xf32> to vector<8x64xbf16>
    %c0_11 = arith.constant 0 : index
    %c0_12 = arith.constant 0 : index
    %15 = vector.load %arg6[%c0_11, %c0_12] : memref<64x64xbf16, #tpu.memory_space<vmem>>, vector<64x64xbf16>
    %cst_13 = arith.constant dense<0.000000e+00> : vector<8x64xf32>
    %16 = tpu.matmul %14, %15, %cst_13 {dimension_numbers = #tpu.dot_dimension_numbers<[1], [0], [0], [1], [0, 0, 1, 1], [], []>} : vector<8x64xbf16>, vector<64x64xbf16>, vector<8x64xf32> -> vector<8x64xf32>
    %c0_14 = arith.constant 0 : index
    %c0_15 = arith.constant 0 : index
    %17 = vector.load %arg7[%c0_14, %c0_15] : memref<1x64xf32, #tpu.memory_space<vmem>>, vector<1x64xf32>
    %18 = vector.broadcast %17 : vector<1x64xf32> to vector<8x64xf32>
    %19 = arith.addf %16, %18 : vector<8x64xf32>
    %cst_16 = arith.constant 0.000000e+00 : f32
    %20 = vector.broadcast %cst_16 : f32 to vector<8x64xf32>
    %21 = arith.maximumf %19, %20 : vector<8x64xf32>
    %c0_17 = arith.constant 0 : index
    %c0_18 = arith.constant 0 : index
    %22 = vector.load %arg8[%c0_17, %c0_18] : memref<1x64xbf16, #tpu.memory_space<vmem>>, vector<1x64xbf16>
    %23 = arith.truncf %21 : vector<8x64xf32> to vector<8x64xbf16>
    %cst_19 = arith.constant dense<0.000000e+00> : vector<1x8xf32>
    %24 = tpu.matmul %22, %23, %cst_19 {dimension_numbers = #tpu.dot_dimension_numbers<[1], [1], [0], [0], [0, 0, 1, 0], [], []>} : vector<1x64xbf16>, vector<8x64xbf16>, vector<1x8xf32> -> vector<1x8xf32>
    %c0_20 = arith.constant 0 : index
    %c0_21 = arith.constant 0 : index
    %25 = vector.load %arg9[%c0_20, %c0_21] : memref<1x1xf32, #tpu.memory_space<vmem>>, vector<1x1xf32>
    %26 = vector.broadcast %25 : vector<1x1xf32> to vector<1x8xf32>
    %27 = arith.addf %24, %26 : vector<1x8xf32>
    %c0_22 = arith.constant 0 : index
    %c0_23 = arith.constant 0 : index
    %28 = vector.load %arg10[%c0_22, %c0_23] : memref<1x8xf32, #tpu.memory_space<vmem>>, vector<1x8xf32>
    tpu.vector_store %arg10[%c0_22, %c0_23], %27 {strides = array<i32>} : memref<1x8xf32, #tpu.memory_space<vmem>>, vector<1x8xf32>,
    return
  }
  func.func @transform_0(%arg0: i32) -> (i32, i32) {
    %c0_i32 = arith.constant 0 : i32
    %c0_i32_0 = arith.constant 0 : i32
    return %arg0, %c0_i32 : i32, i32
  }
  func.func @transform_1(%arg0: i32) -> (i32, i32) {
    %c0_i32 = arith.constant 0 : i32
    %c0_i32_0 = arith.constant 0 : i32
    return %arg0, %c0_i32 : i32, i32
  }
  func.func @transform_2(%arg0: i32) -> (i32, i32) {
    %c0_i32 = arith.constant 0 : i32
    %c0_i32_0 = arith.constant 0 : i32
    %c0_i32_1 = arith.constant 0 : i32
    return %c0_i32, %c0_i32_0 : i32, i32
  }
  func.func @transform_3(%arg0: i32) -> (i32, i32) {
    %c0_i32 = arith.constant 0 : i32
    %c0_i32_0 = arith.constant 0 : i32
    %c0_i32_1 = arith.constant 0 : i32
    return %c0_i32, %c0_i32_0 : i32, i32
  }
  func.func @transform_4(%arg0: i32) -> (i32, i32) {
    %c0_i32 = arith.constant 0 : i32
    %c0_i32_0 = arith.constant 0 : i32
    %c0_i32_1 = arith.constant 0 : i32
    return %c0_i32, %c0_i32_0 : i32, i32
  }
  func.func @transform_5(%arg0: i32) -> (i32, i32) {
    %c0_i32 = arith.constant 0 : i32
    %c0_i32_0 = arith.constant 0 : i32
    %c0_i32_1 = arith.constant 0 : i32
    return %c0_i32, %c0_i32_0 : i32, i32
  }
  func.func @transform_6(%arg0: i32) -> (i32, i32) {
    %c0_i32 = arith.constant 0 : i32
    %c0_i32_0 = arith.constant 0 : i32
    %c0_i32_1 = arith.constant 0 : i32
    return %c0_i32, %c0_i32_0 : i32, i32
  }
  func.func @transform_7(%arg0: i32) -> (i32, i32) {
    %c0_i32 = arith.constant 0 : i32
    %c0_i32_0 = arith.constant 0 : i32
    %c0_i32_1 = arith.constant 0 : i32
    return %c0_i32, %c0_i32_0 : i32, i32
  }
  func.func @transform_8(%arg0: i32) -> (i32, i32) {
    %c0_i32 = arith.constant 0 : i32
    %c0_i32_0 = arith.constant 0 : i32
    %c0_i32_1 = arith.constant 0 : i32
    return %c0_i32, %c0_i32_0 : i32, i32
  }
  func.func @transform_9(%arg0: i32) -> (i32, i32) {
    %c0_i32 = arith.constant 0 : i32
    %c0_i32_0 = arith.constant 0 : i32
    return %c0_i32, %arg0 : i32, i32
  }
}

</mosaic_0001>

<bundles_post_ra>
// kernel: tpu_custom_call.1
= control target key start
LH: loop header
LB: loop body
LE: loop exit
PB: predicated region body
PF: predicated region fallthrough
CT: control target
= control target key end

     0   :  { %s648_s0 = inlined_call_operand.hbm [shape: f32[8,24], index: 0, kind: input, shape index: {}]   ;;  %s649_s1 = inlined_call_operand.hbm [shape: f32[8,8], index: 1, kind: input, shape index: {}]   ;;  %s650_s2 = inlined_call_operand.hbm [shape: bf16[24,64], index: 2, kind: input, shape index: {}]   ;;  %s651_s3 = inlined_call_operand.vmem [shape: bf16[8,64], index: 3, kind: input, shape index: {}]   ;;  %s652_s4 = inlined_call_operand.vmem [shape: f32[1,64], index: 4, kind: input, shape index: {}]   ;;  %s653_s5 = inlined_call_operand.hbm [shape: bf16[64,64], index: 5, kind: input, shape index: {}]   ;;  %s654_s6 = inlined_call_operand.vmem [shape: f32[1,64], index: 6, kind: input, shape index: {}]   ;;  %s655_s7 = inlined_call_operand.vmem [shape: bf16[1,64], index: 7, kind: input, shape index: {}]   ;;  %s656_s8 = inlined_call_operand.<no memory space> [shape: f32[1,1], index: 8, kind: input, shape index: {}]   ;;  %s657_s9 = inlined_call_operand.hbm [shape: f32[1,8], index: 9, kind: output, shape index: {}]  }
   0x1   :  { %v14_v0 = vstv %s656_s8 }
   0x2   :  { %15 = vst [vmem:[#allocation2] sm:$0x1] %v14_v0 }
   0x3   :  { %16 = vsyncpa [#allocation4], 0 }
   0x4   :  { %17 = vsyncpa [#allocation7], 0 }
   0x5   :  { %18 = vsyncpa [#allocation10], 0 }
   0x6   :  { %19 = vsyncpa [#allocation5], 0  ;;  %s551_s11 = smov [#allocation6]   ;;  %s552_s13 = smov [#allocation3]  }
   0x7   :  { %s36_s12 = sshll.u32 %s551_s11, 4  ;;  %s26_s14 = sshll.u32 %s552_s13, 4  ;;  %s37_s12 = int_to_ptr.vmem [resolvable:$true] %s36_s12  ;;  %s27_s14 = int_to_ptr.vmem [resolvable:$true] %s26_s14 }
   0x8   :  { %s451_s15 = scalar_lea.vmem %s37_s12, 128  ;;  %p456_p1 = scmp.lt.s32.totalorder %s37_s12, %s37_s12 }
   0x9   :  { %p452_p0 = scmp.ne.s32.totalorder %s37_s12, %s451_s15  ;;  %p457_p2 = scmp.lt.s32.totalorder %s451_s15, %s451_s15 }
   0xb   :  { %p458_p3 = por %p457_p2, %p456_p1 }
   0xd   :  { %p459_p4 = pnand %p458_p3, %p452_p0 }
   0xf   :  { %462 = shalt.err (!%p459_p4)
}
  0x10   :  { %39 = dma.hbm_to_vmem [thread:$0]  %s649_s1, 128, %s37_s12, [#allocation7]  }
  0x11   :  { %s471_s17 = scalar_lea.vmem %s27_s14, 128  ;;  %p476_p6 = scmp.lt.s32.totalorder %s27_s14, %s27_s14 }
  0x12   :  { %p472_p5 = scmp.ne.s32.totalorder %s27_s14, %s471_s17  ;;  %p477_p7 = scmp.lt.s32.totalorder %s471_s17, %s471_s17 }
  0x14   :  { %p478_p8 = por %p477_p7, %p476_p6 }
  0x16   :  { %p479_p9 = pnand %p478_p8, %p472_p5 }
  0x18   :  { %482 = shalt.err (!%p479_p9)
}
  0x19   :  { %29 = dma.hbm_to_vmem [thread:$0]  %s648_s0, 128, %s27_s14, [#allocation4]  }
  0x1a   :  { %s553_s20 = smov [#allocation8]  }
  0x1b   :  { %s45_s21 = sshll.u32 %s553_s20, 4  ;;  %s46_s21 = int_to_ptr.vmem [resolvable:$true] %s45_s21 }
  0x1c   :  { %s491_s22 = scalar_lea.vmem %s46_s21, 192  ;;  %p496_p11 = scmp.lt.s32.totalorder %s46_s21, %s46_s21 }
  0x1d   :  { %p492_p10 = scmp.ne.s32.totalorder %s46_s21, %s491_s22  ;;  %p497_p12 = scmp.lt.s32.totalorder %s491_s22, %s491_s22 }
  0x1f   :  { %p498_p13 = por %p497_p12, %p496_p11 }
  0x21   :  { %p499_p0 = pnand %p498_p13, %p492_p10 }
  0x23   :  { %502 = shalt.err (!%p499_p0)
}
  0x24   :  { %s554_s1 = smov 64   ;;  %s555_s23 = smov 4  }
  0x25   :  { %51 = dma.hbm_to_vmem [thread:$0]  %s650_s2, 192, %s46_s21, [#allocation7], %s554_s1, %s554_s1, %s555_s23  }
  0x26   :  { %s556_s26 = smov [#allocation9]  }
  0x27   :  { %s61_s27 = sshll.u32 %s556_s26, 4  ;;  %s62_s27 = int_to_ptr.vmem [resolvable:$true] %s61_s27 }
  0x28   :  { %s511_s0 = scalar_lea.vmem %s62_s27, 512  ;;  %p516_p2 = scmp.lt.s32.totalorder %s62_s27, %s62_s27 }
  0x29   :  { %p512_p1 = scmp.ne.s32.totalorder %s62_s27, %s511_s0  ;;  %p517_p3 = scmp.lt.s32.totalorder %s511_s0, %s511_s0 }
  0x2b   :  { %p518_p4 = por %p517_p3, %p516_p2 }
  0x2d   :  { %p519_p5 = pnand %p518_p4, %p512_p1 }
  0x2f   :  { %522 = shalt.err (!%p519_p5)
}
  0x30   :  { %67 = dma.hbm_to_vmem [thread:$0]  %s653_s5, 512, %s62_s27, [#allocation10], %s554_s1, %s554_s1, %s555_s23  }
  0x31   :  { %543 = dma.done.wait [#allocation4], 128  }
  0x32   :  { %544 = vsyncadd [#allocation4], 4294967168 }
  0x33   :  { %545 = dma.done.wait [#allocation7], 320  }
  0x34   :  { %546 = vsyncadd [#allocation7], 4294966976 }
  0x35   :  { %547 = dma.done.wait [#allocation10], 512  }
  0x36   :  { %548 = vsyncadd [#allocation10], 4294966784  ;;  %v557_v1 = vmov 0.0   ;;  %vm558_vm0 = vmmov 0   ;;  %vm99_vm1 = vcmask 1043456   ;;  %v89_v5 = vld [vmem:[#allocation6] sm:$0xff]  ;;  %v301_v40 = vlaneseq }
  0x37   :  { %394 = vmatprep.subr.bf16.mxu0 %v557_v1  ;;  %400 = vmatprep.subr.bf16.mxu1 %v557_v1  ;;  %v94_v2 = vld [vmem:[%s651_s3] sm:$0xf]  ;;  %v437_v3 = vld [vmem:[#allocation8 + $0x8] ss:$0 sps:$4 sm:$0xff]   ;;  %v90_v7 = vpack.c.bf16 %v89_v5, %v89_v5  ;;  %vm95_vm2 = vcmask 64512   ;;  %v438_v8 = vld [vmem:[#allocation8] sm:$0xff]  }
  0x38   :  { %396 = vmatprep.mubr.msk.bf16.mxu0 %vm558_vm0, %v557_v1  ;;  %404 = vmatprep.mubr.msk.bf16.mxu1 %vm558_vm0, %v557_v1  ;;  %v101_v4 = vsel %vm99_vm1, %v94_v2, 0  ;;  %v157_v6 = vsel %vm99_vm1, %v437_v3, 0  ;;  %v87_v9 = vld [vmem:[#allocation3] sm:$0xff]  ;;  %vm152_vm3 = vcmask 195584   ;;  %v439_v11 = vld [vmem:[#allocation9 + $0x18] sm:$0xff]   ;;  %v440_v12 = vld [vmem:[#allocation9 + $0x10] sm:$0xff]  }
  0x39   :  { %395 = vmatpush3.bf16.msra.mxu0 %v101_v4  ;;  %401 = vmatpush3.bf16.msra.mxu1 %v157_v6  ;;  %v88_v10 = vpack.c.bf16 %v87_v9, %v87_v9  ;;  %v441_v13 = vld [vmem:[#allocation9 + $0x8] sm:$0xff]   ;;  %v442_v14 = vld [vmem:[#allocation9] sm:$0xff]   ;;  %vm248_vm4 = vcmask 523264   ;;  %v559_v29 = vmov 0   ;;  %v302_v41 = vshrl.u32 %v301_v40, 7 }
  0x3a   :  { %408 = vmatprep.subr.bf16.mxu0 %v557_v1  ;;  %402 = vmatprep.subr.bf16.mxu1 %v557_v1  ;;  %v374_v19 = vld [vmem:[%s652_s4] ss:$0 sm:$0xff]  ;;  %vm351_vm5 = vcmask 57344  }
  0x3b   :  { %v295_v28 = vld [vmem:[#allocation2] sm:$0x1]  ;;  %436 = vset.pattern.permute.xlu0 %v559_v29  ;;  %v303_v42 = vsub.s32 0, %v302_v41 }
  0x3c   :  { %397 = vmatmul.mubr.msk.bf16.vlgmr.msra.gmra.mxu0 %vm95_vm2, %v90_v7  ;;  %298 = vperm.xlu0 %436, %v295_v28   ;;  %v375_v30 = vld [vmem:[%s654_s6] ss:$0 sm:$0xff]  ;;  %s560_s6 = smov [#allocation11]  }
  0x3d   :  { %416 = vmatprep.mubr.msk.bf16.mxu0 %vm558_vm0, %v557_v1  ;;  %403 = vmatpush3.bf16.msra.mxu1 %v438_v8  ;;  %v293_v39 = vld [vmem:[%s655_s7] sm:$0x1]  ;;  %s359_s13 = sshll.u32 %s560_s6, 4  ;;  %s360_s13 = int_to_ptr.vmem [resolvable:$true] %s359_s13 }
  0x3e   :  { %420 = vmatprep.subr.bf16.mxu1 %v557_v1  ;;  %409 = vmatpush3.bf16.msra.mxu0 %v439_v11  ;;  %s523_s14 = scalar_lea.vmem %s360_s13, 16  ;;  %s527_s15 = scalar_lea.vmem %s360_s13, 32 }
  0x3f   :  { %410 = vmatprep.subr.bf16.mxu0 %v557_v1  ;;  %p524_p6 = scmp.ne.s32.totalorder %s360_s13, %s523_s14  ;;  %p528_p7 = scmp.lt.s32.totalorder %s360_s13, %s360_s13 }
  0x40   :  { %405 = vmatmul.mubr.msk.bf16.vlgmr.msra.gmra.mxu1 %vm152_vm3, %v88_v10  ;;  %p529_p8 = scmp.lt.s32.totalorder %s527_s15, %s523_s14 }
  0x41   :  { %422 = vmatprep.mubr.msk.bf16.mxu1 %vm558_vm0, %v557_v1 }
  0x42   :  { %411 = vmatpush3.bf16.msra.mxu0 %v440_v12  ;;  %p530_p9 = por %p529_p8, %p528_p7 }
  0x43   :  { %412 = vmatprep.subr.bf16.mxu0 %v557_v1 }
  0x44   :  { %p531_p10 = pnand %p530_p9, %p524_p6 }
  0x46   :  { %413 = vmatpush3.bf16.msra.mxu0 %v441_v13 }
  0x47   :  { %414 = vmatprep.subr.bf16.mxu0 %v557_v1 }
  0x4a   :  { %415 = vmatpush3.bf16.msra.mxu0 %v442_v14 }
  0xb7   :  { %v299_v43 = vpop.permute.xlu0 %298 }
  0xb8   :  { %v304_v44 = vrot.slane %v299_v43, %v303_v42 }
  0xfc   :  { %v137_v15 = vpop.f32.mrf.mxu0 }
  0xfe   :  { %v398_v16 = vpop.f32.mrf.mxu0 }
 0x100   :  { %v140_v17 = vpop.f32.mrf.mxu0  ;;  %v193_v18 = vpop.f32.mrf.mxu1 }
 0x101   :  { %v194_v21 = vadd.f32 %v193_v18, %v137_v15 }
 0x102   :  { %v399_v20 = vpop.f32.mrf.mxu0  ;;  %v406_v22 = vpop.f32.mrf.mxu1 }
 0x103   :  { %v206_v23 = vadd.f32 %v374_v19, %v194_v21 }
 0x104   :  { %v196_v24 = vpop.f32.mrf.mxu1 }
 0x105   :  { %v207_v25 = vmax.f32 %v206_v23, 0.0 }
 0x106   :  { %v407_v26 = vpop.f32.mrf.mxu1 }
 0x107   :  { %v208_v27 = vpack.c.bf16 %v207_v25, %v207_v25 }
 0x109   :  { %417 = vmatmul.mubr.msk.bf16.vlgmr.msra.gmra.mxu0 %vm248_vm4, %v208_v27 }
 0x1c9   :  { %v286_v31 = vpop.f32.mrf.mxu0 }
 0x1ca   :  { %v287_v32 = vadd.f32 %v375_v30, %v286_v31 }
 0x1cb   :  { %v418_v33 = vpop.f32.mrf.mxu0 }
 0x1cc   :  { %v292_v34 = vmax.f32 %v287_v32, 0.0 }
 0x1cd   :  { %v289_v35 = vpop.f32.mrf.mxu0 }
 0x1ce   :  { %v294_v36 = vpack.c.bf16 %v292_v34, %v292_v34 }
 0x1cf   :  { %v419_v37 = vpop.f32.mrf.mxu0 }
 0x1d0   :  { %v309_v38 = vsel %vm248_vm4, %v294_v36, 0 }
 0x1d1   :  { %421 = vmatpush3.bf16.xpose.msra.mxu1 %v309_v38 }
 0x1d8   :  { %423 = vmatmul.mubr.msk.bf16.vlgmr.msra.gmra.mxu1 %vm248_vm4, %v293_v39 }
 0x298   :  { %v345_v45 = vpop.f32.mrf.mxu1 }
 0x299   :  { %v346_v46 = vadd.f32 %v345_v45, %v304_v44 }
 0x29a   :  { %v424_v47 = vpop.f32.mrf.mxu1 }
 0x29b   :  { %352 = vst.msk [vmem:[#allocation11] sm:$0x1] %vm351_vm5, %v346_v46 }
 0x29c   :  { %v348_v48 = vpop.f32.mrf.mxu1 }
 0x29d   :  { %534 = shalt.err (!%p531_p10)
}
 0x29e   :  { %362 = dma.vmem_to_hbm [thread:$0]  %s360_s13, 16, %s657_s9, [#allocation5]   ;;  %v425_v49 = vpop.f32.mrf.mxu1 }
 0x29f   :  { %549 = dma.done.wait [#allocation5], 16  }
 0x2a0   :  { %550 = vsyncadd [#allocation5], 4294967280 }
 0x2a1   :  { %366 = vsyncpa [#allocation4], 1 }
 0x2a2   :  { %367 = vsyncpa [#allocation7], 1 }
 0x2a3   :  { %368 = vsyncpa [#allocation10], 1 }
 0x2a4   :  { %369 = vsyncpa [#allocation5], 1 }

</bundles_post_ra>
